<compile_context>
chip_gen: v6e
topology: v6e:2x2x1
jax: 0.10.0
libtpu: 0.0.40
codegen_flags: <defaults>
</compile_context>

<pallas_src>
import jax
import jax.numpy as jnp
from jax.experimental import pallas as pl
from jax.experimental.pallas import tpu as pltpu

ACT_PRIMITIVES = ['elu', 'sigmoid', 'tanh', 'relu', 'relu6', 'softplus',
                  'leaky_relu']

LANE = 128                         # TPU lane width
TILE_BYTES = 4 * 1024 * 1024       # ~4 MiB of real data per tile (dtype-aware)
MIN_GRID = 4                       # >= 2*num_cores (v7x) grid steps for big arrays
VMEM_LIMIT = 32 * 1024 * 1024      # 2x in + 2x out @ 4 MiB = 16 MiB << 32 MiB


def act_mixed_kernel(w_ref, x_ref, o_ref):
    """w_ref: SMEM (7,) f32 mixture weights; x_ref/o_ref: VMEM (TM, W) tiles."""
    x = x_ref[...].astype(jnp.float32)

    # Scalar weights (SMEM -> sregs); all scalar algebra below is free.
    w_elu, w_sig, w_tanh = w_ref[0], w_ref[1], w_ref[2]
    w_relu, w_relu6, w_sp, w_lrelu = w_ref[3], w_ref[4], w_ref[5], w_ref[6]
    # elu(+), relu, relu6(+), softplus(+), leaky(+) share slope 1 for x >= 0.
    w_pos = w_elu + w_relu + w_relu6 + w_sp + w_lrelu
    w_neg = 0.01 * w_lrelu                 # leaky_relu negative slope
    w_sig_m_elu = w_sig - w_elu

    nonneg = x >= 0.0                      # single mask, reused everywhere

    # 1) Piecewise-linear part in one select + one mul.
    acc = jnp.where(nonneg, w_pos, w_neg) * x

    # 2) Shared transcendental: e = exp(-|x|)   (one EUP exp).
    e = jnp.exp(jnp.minimum(x, -x))

    # 3) sigmoid: r = 1/(1+e);  sigmoid = r (x>=0) else 1-r.
    r = pl.reciprocal(1.0 + e, approx=True)
    # 4) tanh: +-(1 - e^2)/(1 + e^2)  (approx vrcp instead of native tanh).
    e2 = e * e
    t = (1.0 - e2) * pl.reciprocal(1.0 + e2, approx=True)
    # 5) elu negative branch: exp(x) - 1 = e - 1 for x < 0.
    # Fold 3)-5) into ONE vector select:
    #   x >= 0:  w_sig*r + w_tanh*t
    #   x <  0:  w_sig*(1-r) - w_tanh*t + w_elu*(e-1)
    #          = (w_sig - w_elu) - (w_sig*r + w_tanh*t) + w_elu*e
    p_branch = w_sig * r + w_tanh * t
    n_branch = (w_sig_m_elu - p_branch) + w_elu * e
    acc = acc + jnp.where(nonneg, p_branch, n_branch)

    # 6) relu6 clamp correction: relu6 = max(x,0) - max(x-6,0).
    acc = acc - w_relu6 * jnp.maximum(x - 6.0, 0.0)

    # 7) softplus tail: softplus = max(x,0) + log1p(e)  (stable; matches
    #    PyTorch's threshold=20 branch to within ~2e-9).
    acc = acc + w_sp * jnp.log1p(e)

    o_ref[...] = acc.astype(o_ref.dtype)


def _choose_layout(rows, itemsize):
    """rows = (#elements)//128. Returns (M, W, TM): x viewed as (M, W), row tile TM."""
    divisors = [c for c in (16, 8, 4, 2, 1) if rows % c == 0]
    # Widest lane multiplier that still leaves enough rows to build >= MIN_GRID
    # blocks of >= 8 sublanes; otherwise just the widest divisor (tiny arrays).
    wide_enough = [c for c in divisors if rows // c >= 8 * MIN_GRID]
    wm = wide_enough[0] if wide_enough else divisors[0]
    W = wm * LANE
    M = rows // wm

    # Rows per tile: dtype-aware VMEM budget ...
    budget_rows = max(8, (TILE_BYTES // (W * itemsize)) // 8 * 8)
    TM = min(M, budget_rows)
    # ... and a grid-length floor so the 'parallel' axis has work for both
    # v7x TensorCores and DMA/compute overlap everywhere.
    if M >= 8 * MIN_GRID:
        TM = min(TM, max(8, (M // MIN_GRID) // 8 * 8))
    elif M >= 16:
        TM = min(TM, max(8, (M // 2) // 8 * 8))
    if TM < M:
        TM = max(8, (TM // 8) * 8)     # multiple of 8 sublanes (or TM == M)
    return M, W, TM


def act_mixed_ref(x, weights):
    """Pure-JAX reference matching PyTorch defaults."""
    acts = [
        jnp.where(x > 0.0, x, jnp.expm1(jnp.minimum(x, 0.0))),           # ELU
        jax.nn.sigmoid(x),                                               # Sigmoid
        jnp.tanh(x),                                                     # Tanh
        jax.nn.relu(x),                                                  # ReLU
        jnp.clip(x, 0.0, 6.0),                                           # ReLU6
        jnp.where(x > 20.0, x,
                  jnp.log1p(jnp.exp(jnp.minimum(x, 20.0)))),             # Softplus
        jnp.where(x > 0.0, x, 0.01 * x),                                 # LeakyReLU
    ]
    return sum(w * a for w, a in zip(weights, acts))


def act_mixed_op(x, weights):
    """x: any-shape float array (e.g. NCHW). weights: (7,) mixture weights."""
    orig_shape = x.shape
    orig_dtype = x.dtype
    flat = x.reshape(-1)
    n = flat.shape[0]
    w32 = weights.astype(jnp.float32)

    n_main = (n // LANE) * LANE
    if n_main == 0:
        # Tiny input (<128 elems): not worth a kernel launch.
        return act_mixed_ref(flat.astype(jnp.float32),
                             w32).astype(orig_dtype).reshape(orig_shape)

    itemsize = x.dtype.itemsize
    rows = n_main // LANE
    M, W, TM = _choose_layout(rows, itemsize)
    x2d = flat[:n_main].reshape(M, W)     # no padding; pure bitcast when n%128==0

    cost = pl.CostEstimate(flops=25 * n_main,
                           transcendentals=4 * n_main,
                           bytes_accessed=2 * n_main * itemsize)

    out2d = pl.pallas_call(
        act_mixed_kernel,
        out_shape=jax.ShapeDtypeStruct((M, W), orig_dtype),
        grid=(pl.cdiv(M, TM),),
        in_specs=[
            pl.BlockSpec(memory_space=pltpu.MemorySpace.SMEM),   # weights
            pl.BlockSpec((TM, W), lambda i: (i, 0)),             # x tile
        ],
        out_specs=pl.BlockSpec((TM, W), lambda i: (i, 0)),
        compiler_params=pltpu.CompilerParams(
            dimension_semantics=("parallel",),
            vmem_limit_bytes=VMEM_LIMIT),
        cost_estimate=cost,
    )(w32, x2d)

    out_main = out2d.reshape(-1)
    if n_main == n:
        return out_main.reshape(orig_shape)

    # Rare <128-element tail: tiny exact pure-JAX epilogue.
    # TODO(synk): large inputs with n % 128 != 0 still pay a prefix-slice +
    # concatenate HBM copy; removing it needs an in-kernel manual-DMA
    # remainder path (pl.ANY + make_async_copy), not warranted for NAS shapes.
    tail = act_mixed_ref(flat[n_main:].astype(jnp.float32),
                         w32).astype(orig_dtype)
    return jnp.concatenate([out_main, tail]).reshape(orig_shape)


if __name__ == "__main__":
    key = jax.random.PRNGKey(0)
    kx, kw, kx2 = jax.random.split(key, 3)

    # Architecture mixture weights (softmax over alphas).
    weights = jax.nn.softmax(
        jax.random.normal(kw, (len(ACT_PRIMITIVES),), dtype=jnp.float32))

    # Primary NCHW input (conv-style search space).
    x = jax.random.normal(kx, (2, 4, 16, 16), dtype=jnp.float32) * 3.0
    out = jax.block_until_ready(act_mixed_op(x, weights))
    ref = act_mixed_ref(x, weights)
    assert out.shape == x.shape and out.dtype == x.dtype
    # approx reciprocal in the sigmoid/tanh paths -> slightly loosened tol.
    assert jnp.allclose(out, ref, atol=2e-3, rtol=2e-3)

    # Secondary check: size not a multiple of 128 (tail path).
    x2 = jax.random.normal(kx2, (2, 3, 5, 7), dtype=jnp.float32) * 3.0
    out2 = jax.block_until_ready(act_mixed_op(x2, weights))
    ref2 = act_mixed_ref(x2, weights)
    assert out2.shape == x2.shape
    assert jnp.allclose(out2, ref2, atol=2e-3, rtol=2e-3)

    # Tertiary check: a larger bf16 slab exercising the multi-step grid path.
    x3 = (jax.random.normal(kx, (8, 32, 32, 32), dtype=jnp.float32) * 3.0
          ).astype(jnp.bfloat16)
    out3 = jax.block_until_ready(act_mixed_op(x3, weights))
    ref3 = act_mixed_ref(x3.astype(jnp.float32), weights)
    assert out3.shape == x3.shape and out3.dtype == x3.dtype
    assert jnp.allclose(out3.astype(jnp.float32), ref3, atol=4e-2, rtol=4e-2)

    print("KERNEL_OK")
</pallas_src>

<mosaic_0001>
module attributes {stable_mosaic.version = 11 : i64} {
  func.func @act_mixed_kernel(%arg0: i32, %arg1: memref<7xf32, #tpu.memory_space<smem>>, %arg2: memref<1x2048xf32, #tpu.memory_space<vmem>>, %arg3: memref<1x2048xf32, #tpu.memory_space<vmem>>) attributes {dimension_semantics = [#tpu.dimension_semantics<parallel>], iteration_bounds = array<i64: 1>, scalar_prefetch = 0 : i64, scratch_operands = 0 : i64, tpu.core_type = #tpu.core_type<tc>, window_params = [{transform_indices = @transform_0, window_bounds = array<i64: 7>}, {transform_indices = @transform_1, window_bounds = array<i64: 1, 2048>}, {transform_indices = @transform_2, window_bounds = array<i64: 1, 2048>}]} {
    %c0 = arith.constant 0 : index
    %c0_0 = arith.constant 0 : index
    %0 = vector.load %arg2[%c0, %c0_0] : memref<1x2048xf32, #tpu.memory_space<vmem>>, vector<1x2048xf32>
    %c0_1 = arith.constant 0 : index
    %1 = memref.load %arg1[%c0_1] : memref<7xf32, #tpu.memory_space<smem>>
    %c1 = arith.constant 1 : index
    %2 = memref.load %arg1[%c1] : memref<7xf32, #tpu.memory_space<smem>>
    %c2 = arith.constant 2 : index
    %3 = memref.load %arg1[%c2] : memref<7xf32, #tpu.memory_space<smem>>
    %c3 = arith.constant 3 : index
    %4 = memref.load %arg1[%c3] : memref<7xf32, #tpu.memory_space<smem>>
    %c4 = arith.constant 4 : index
    %5 = memref.load %arg1[%c4] : memref<7xf32, #tpu.memory_space<smem>>
    %c5 = arith.constant 5 : index
    %6 = memref.load %arg1[%c5] : memref<7xf32, #tpu.memory_space<smem>>
    %c6 = arith.constant 6 : index
    %7 = memref.load %arg1[%c6] : memref<7xf32, #tpu.memory_space<smem>>
    %8 = arith.addf %1, %4 : f32
    %9 = arith.addf %8, %5 : f32
    %10 = arith.addf %9, %6 : f32
    %11 = arith.addf %10, %7 : f32
    %cst = arith.constant 0.00999999977 : f32
    %12 = arith.mulf %cst, %7 : f32
    %13 = arith.subf %2, %1 : f32
    %cst_2 = arith.constant 0.000000e+00 : f32
    %14 = vector.broadcast %cst_2 : f32 to vector<1x2048xf32>
    %15 = arith.cmpf oge, %0, %14 : vector<1x2048xf32>
    %16 = vector.broadcast %11 : f32 to vector<1x2048xf32>
    %17 = vector.broadcast %12 : f32 to vector<1x2048xf32>
    %18 = arith.select %15, %16, %17 : vector<1x2048xi1>, vector<1x2048xf32>
    %19 = arith.mulf %18, %0 : vector<1x2048xf32>
    %cst_3 = arith.constant 0.000000e+00 : f32
    %20 = vector.broadcast %cst_3 : f32 to vector<1x2048xf32>
    %21 = arith.subf %20, %0 : vector<1x2048xf32>
    %22 = arith.minimumf %0, %21 : vector<1x2048xf32>
    %23 = math.exp %22 : vector<1x2048xf32>
    %cst_4 = arith.constant 1.000000e+00 : f32
    %24 = vector.broadcast %cst_4 : f32 to vector<1x2048xf32>
    %25 = arith.addf %24, %23 : vector<1x2048xf32>
    %26 = tpu.reciprocal %25 {approx = true} : vector<1x2048xf32> -> vector<1x2048xf32>
    %27 = arith.mulf %23, %23 : vector<1x2048xf32>
    %cst_5 = arith.constant 1.000000e+00 : f32
    %28 = vector.broadcast %cst_5 : f32 to vector<1x2048xf32>
    %29 = arith.subf %28, %27 : vector<1x2048xf32>
    %cst_6 = arith.constant 1.000000e+00 : f32
    %30 = vector.broadcast %cst_6 : f32 to vector<1x2048xf32>
    %31 = arith.addf %30, %27 : vector<1x2048xf32>
    %32 = tpu.reciprocal %31 {approx = true} : vector<1x2048xf32> -> vector<1x2048xf32>
    %33 = arith.mulf %29, %32 : vector<1x2048xf32>
    %34 = vector.broadcast %2 : f32 to vector<1x2048xf32>
    %35 = arith.mulf %34, %26 : vector<1x2048xf32>
    %36 = vector.broadcast %3 : f32 to vector<1x2048xf32>
    %37 = arith.mulf %36, %33 : vector<1x2048xf32>
    %38 = arith.addf %35, %37 : vector<1x2048xf32>
    %39 = vector.broadcast %13 : f32 to vector<1x2048xf32>
    %40 = arith.subf %39, %38 : vector<1x2048xf32>
    %41 = vector.broadcast %1 : f32 to vector<1x2048xf32>
    %42 = arith.mulf %41, %23 : vector<1x2048xf32>
    %43 = arith.addf %40, %42 : vector<1x2048xf32>
    %44 = arith.select %15, %38, %43 : vector<1x2048xi1>, vector<1x2048xf32>
    %45 = arith.addf %19, %44 : vector<1x2048xf32>
    %cst_7 = arith.constant 6.000000e+00 : f32
    %46 = vector.broadcast %cst_7 : f32 to vector<1x2048xf32>
    %47 = arith.subf %0, %46 : vector<1x2048xf32>
    %cst_8 = arith.constant 0.000000e+00 : f32
    %48 = vector.broadcast %cst_8 : f32 to vector<1x2048xf32>
    %49 = arith.maximumf %47, %48 : vector<1x2048xf32>
    %50 = vector.broadcast %5 : f32 to vector<1x2048xf32>
    %51 = arith.mulf %50, %49 : vector<1x2048xf32>
    %52 = arith.subf %45, %51 : vector<1x2048xf32>
    %53 = math.log1p %23 : vector<1x2048xf32>
    %54 = vector.broadcast %6 : f32 to vector<1x2048xf32>
    %55 = arith.mulf %54, %53 : vector<1x2048xf32>
    %56 = arith.addf %52, %55 : vector<1x2048xf32>
    %c0_9 = arith.constant 0 : index
    %c0_10 = arith.constant 0 : index
    %57 = vector.load %arg3[%c0_9, %c0_10] : memref<1x2048xf32, #tpu.memory_space<vmem>>, vector<1x2048xf32>
    tpu.vector_store %arg3[%c0_9, %c0_10], %56 {strides = array<i32>} : memref<1x2048xf32, #tpu.memory_space<vmem>>, vector<1x2048xf32>,
    return
  }
  func.func @transform_0(%arg0: i32) -> i32 {
    %c0_i32 = arith.constant 0 : i32
    %c0_i32_0 = arith.constant 0 : i32
    return %c0_i32 : i32
  }
  func.func @transform_1(%arg0: i32) -> (i32, i32) {
    %c0_i32 = arith.constant 0 : i32
    %c0_i32_0 = arith.constant 0 : i32
    return %arg0, %c0_i32 : i32, i32
  }
  func.func @transform_2(%arg0: i32) -> (i32, i32) {
    %c0_i32 = arith.constant 0 : i32
    %c0_i32_0 = arith.constant 0 : i32
    return %arg0, %c0_i32 : i32, i32
  }
}

</mosaic_0001>

<bundles_post_ra>
// kernel: tpu_custom_call.1
= control target key start
LH: loop header
LB: loop body
LE: loop exit
PB: predicated region body
PF: predicated region fallthrough
CT: control target
= control target key end

     0   :  { %7 = vsyncpa [#allocation5], 0  ;;  %s324_s0 = inlined_call_operand.hbm [shape: f32[7], index: 0, kind: input, shape index: {}]   ;;  %s325_s1 = inlined_call_operand.hbm [shape: f32[1,2048], index: 1, kind: input, shape index: {}]   ;;  %s326_s2 = inlined_call_operand.hbm [shape: f32[1,2048], index: 2, kind: output, shape index: {}]  }
   0x1   :  { %8 = vsyncpa [#allocation3], 0 }
   0x2   :  { %9 = vsyncpa [#allocation4], 0  ;;  %s231_s9 = smov [#allocation2]   ;;  %s232_s12 = smov [#allocation6]  }
   0x3   :  { %17 = dma.hbm_to_smem %s324_s0, 16, %s231_s9, [#allocation5]  }
   0x4   :  { %s24_s13 = sshll.u32 %s232_s12, 4  ;;  %s25_s13 = int_to_ptr.vmem [resolvable:$true] %s24_s13 }
   0x5   :  { %s193_s14 = scalar_lea.vmem %s25_s13, 256  ;;  %p198_p1 = scmp.lt.s32.totalorder %s25_s13, %s25_s13 }
   0x6   :  { %p194_p0 = scmp.ne.s32.totalorder %s25_s13, %s193_s14  ;;  %p199_p2 = scmp.lt.s32.totalorder %s193_s14, %s193_s14 }
   0x8   :  { %p200_p3 = por %p199_p2, %p198_p1 }
   0xa   :  { %p201_p4 = pnand %p200_p3, %p194_p0 }
   0xc   :  { %204 = shalt.err (!%p201_p4)
}
   0xd   :  { %27 = dma.hbm_to_vmem [thread:$0]  %s325_s1, 256, %s25_s13, [#allocation3]  }
   0xe   :  { %225 = dma.done.wait [#allocation5], 16  }
   0xf   :  { %226 = vsyncadd [#allocation5], 4294967280 }
  0x10   :  { %227 = dma.done.wait [#allocation3], 256  }
  0x11   :  { %228 = vsyncadd [#allocation3], 4294967040 }
  0x12   :  { %34 = sfence }
  0x13   :  { %v255_v0 = vld [vmem:[#allocation6] sm:$0xff]  ;;  %v257_v1 = vld [vmem:[#allocation6 + $0x8] sm:$0xff]  ;;  %s263_s0 = sld [smem:[#allocation2]]  ;;  %s233_s28 = smov [#allocation7]  }
  0x14   :  { %v58_v2 = vsub.f32 0.0, %v255_v0  ;;  %v59_v3 = vsub.f32 0.0, %v257_v1  ;;  %s152_s1 = sld [smem:[#allocation2 + $0x3]]  ;;  %v156_v20 = vadd.f32 -6.0, %v255_v0  ;;  %vm50_vm0 = vcmp.ge.f32.partialorder %v255_v0, 0.0  ;;  %s140_s29 = sshll.u32 %s233_s28, 4  ;;  %s141_s29 = int_to_ptr.vmem [resolvable:$true] %s140_s29 }
  0x15   :  { %s265_s17 = sld [smem:[#allocation2 + $0x4]]  ;;  %vm51_vm1 = vcmp.ge.f32.partialorder %v257_v1, 0.0  ;;  %v157_v36 = vadd.f32 -6.0, %v257_v1  ;;  %s205_s30 = scalar_lea.vmem %s141_s29, 256 }
  0x16   :  { %v60_v4 = vmin.f32 %v255_v0, %v58_v2  ;;  %v61_v5 = vmin.f32 %v257_v1, %v59_v3  ;;  %s269_s18 = sld [smem:[#allocation2 + $0x5]]  ;;  %v102_v34 = vmax.f32 %v156_v20, 0.0  ;;  %p206_p5 = scmp.ne.s32.totalorder %s141_s29, %s205_s30 }
  0x17   :  { %s155_s20 = sld [smem:[#allocation2 + $0x6]]  ;;  %v103_v59 = vmax.f32 %v157_v36, 0.0  ;;  %p210_p6 = scmp.lt.s32.totalorder %s141_s29, %s141_s29 }
  0x18   :  { %v62_v6 = vmul.f32 1.442695, %v60_v4  ;;  %v64_v7 = vmul.f32 1.442695, %v61_v5  ;;  %s276_s22 = sld [smem:[#allocation2 + $0x1]]  ;;  %p211_p7 = scmp.lt.s32.totalorder %s205_s30, %s205_s30 }
  0x19   :  { %s278_s23 = sld [smem:[#allocation2 + $0x2]]  ;;  %v91_v27 = vstv %s263_s0 }
  0x1a   :  { %161 = vpow2.f32 %v62_v6  ;;  %s44_s19 = sadd.f32 %s152_s1, %s263_s0  ;;  %p212_p8 = por %p211_p7, %p210_p6 }
  0x1b   :  { %163 = vpow2.f32 %v64_v7  ;;  %v104_v50 = vstv %s265_s17 }
  0x1c   :  { %s45_s21 = sadd.f32 %s265_s17, %s44_s19  ;;  %v127_v63 = vstv %s269_s18  ;;  %v105_v3 = vmul.f32 %v104_v50, %v102_v34  ;;  %p213_p9 = pnand %p212_p8, %p206_p5 }
  0x1d   :  { %s48_s25 = smul.f32 0.01, %s155_s20 }
  0x1e   :  { %s46_s24 = sadd.f32 %s269_s18, %s45_s21  ;;  %v80_v19 = vstv %s276_s22 }
  0x1f   :  { %s49_s27 = ssub.f32 %s276_s22, %s263_s0  ;;  %v53_v25 = vstv %s48_s25  ;;  %v83_v26 = vstv %s278_s23 }
  0x20   :  { %s281_s26 = sadd.f32 %s155_s20, %s46_s24 }
  0x21   :  { %v88_v43 = vstv %s49_s27 }
  0x22   :  { %v52_v29 = vstv %s281_s26 }
  0x23   :  { %v54_v42 = vsel %vm50_vm0, %v52_v29, %v53_v25  ;;  %v55_v52 = vsel %vm51_vm1, %v52_v29, %v53_v25 }
  0x24   :  { %v56_v58 = vmul.f32 %v54_v42, %v255_v0  ;;  %v57_v4 = vmul.f32 %v55_v52, %v257_v1 }
  0x27   :  { %v162_v8 = vpop.eup %161 }
  0x28   :  { %v267_v9 = vpop.eup %163  ;;  %v66_v10 = vadd.f32 1.0, %v162_v8  ;;  %v70_v11 = vmul.f32 %v162_v8, %v162_v8  ;;  %v112_v17 = vmul.f32 -0.5, %v162_v8  ;;  %v115_v35 = vand.u32 2147483647, %v162_v8 }
  0x29   :  { %v67_v12 = vadd.f32 1.0, %v267_v9  ;;  %v71_v13 = vmul.f32 %v267_v9, %v267_v9  ;;  %v121_v23 = vmul.f32 -0.5, %v267_v9  ;;  %v92_v44 = vmul.f32 %v162_v8, %v91_v27 }
  0x2a   :  { %165 = vrcp.f32 %v66_v10  ;;  %v74_v14 = vadd.f32 1.0, %v70_v11  ;;  %v72_v16 = vsub.f32 1.0, %v70_v11  ;;  %v113_v32 = vadd.f32 1.0, %v112_v17 }
  0x2b   :  { %167 = vlog2.f32 %v66_v10  ;;  %v75_v15 = vadd.f32 1.0, %v71_v13  ;;  %v73_v22 = vsub.f32 1.0, %v71_v13  ;;  %v122_v40 = vadd.f32 1.0, %v121_v23 }
  0x2c   :  { %169 = vrcp.f32 %v74_v14  ;;  %v124_v45 = vand.u32 2147483647, %v267_v9  ;;  %v114_v48 = vmul.f32 %v162_v8, %v113_v32  ;;  %vm298_vm2 = vcmp.lt.f32.partialorder %v115_v35, 0.0004427343 }
  0x2d   :  { %171 = vrcp.f32 %v67_v12  ;;  %v93_v53 = vmul.f32 %v267_v9, %v91_v27  ;;  %v123_v57 = vmul.f32 %v267_v9, %v122_v40  ;;  %v106_v10 = vmul.f32 %v104_v50, %v103_v59 }
  0x2e   :  { %173 = vrcp.f32 %v75_v15  ;;  %vm307_vm3 = vcmp.lt.f32.partialorder %v124_v45, 0.0004427343 }
  0x2f   :  { %175 = vlog2.f32 %v67_v12 }
  0x37   :  { %v166_v18 = vpop.eup %165 }
  0x38   :  { %v168_v21 = vpop.eup %167  ;;  %v81_v31 = vmul.f32 %v166_v18, %v80_v19 }
  0x39   :  { %v170_v24 = vpop.eup %169  ;;  %v111_v47 = vmul.f32 0.6931472, %v168_v21 }
  0x3a   :  { %v172_v28 = vpop.eup %171  ;;  %v78_v30 = vmul.f32 %v170_v24, %v72_v16 }
  0x3b   :  { %v174_v33 = vpop.eup %173  ;;  %v82_v39 = vmul.f32 %v172_v28, %v80_v19  ;;  %v117_v62 = vsel %vm298_vm2, %v114_v48, %v111_v47 }
  0x3c   :  { %v84_v37 = vmul.f32 %v83_v26, %v78_v30  ;;  %v79_v38 = vmul.f32 %v174_v33, %v73_v22  ;;  %v176_v41 = vpop.eup %175  ;;  %v128_v9 = vmul.f32 %v127_v63, %v117_v62 }
  0x3d   :  { %v120_v56 = vmul.f32 0.6931472, %v176_v41 }
  0x3e   :  { %v86_v46 = vadd.f32 %v84_v37, %v81_v31  ;;  %v85_v49 = vmul.f32 %v83_v26, %v79_v38 }
  0x3f   :  { %v126_v7 = vsel %vm307_vm3, %v123_v57, %v120_v56 }
  0x40   :  { %v89_v54 = vsub.f32 %v88_v43, %v86_v46  ;;  %v87_v55 = vadd.f32 %v85_v49, %v82_v39  ;;  %v129_v14 = vmul.f32 %v127_v63, %v126_v7 }
  0x42   :  { %v94_v61 = vadd.f32 %v92_v44, %v89_v54  ;;  %v90_v2 = vsub.f32 %v88_v43, %v87_v55 }
  0x44   :  { %v96_v5 = vsel %vm50_vm0, %v86_v46, %v94_v61  ;;  %v95_v6 = vadd.f32 %v93_v53, %v90_v2 }
  0x45   :  { %v98_v8 = vadd.f32 %v96_v5, %v56_v58 }
  0x46   :  { %v97_v11 = vsel %vm51_vm1, %v87_v55, %v95_v6 }
  0x47   :  { %v107_v12 = vsub.f32 %v98_v8, %v105_v3  ;;  %v99_v13 = vadd.f32 %v97_v11, %v57_v4 }
  0x49   :  { %v130_v15 = vadd.f32 %v128_v9, %v107_v12  ;;  %v108_v16 = vsub.f32 %v99_v13, %v106_v10 }
  0x4b   :  { %132 = vst [vmem:[#allocation7] sm:$0xff] %v130_v15  ;;  %v131_v0 = vadd.f32 %v129_v14, %v108_v16 }
  0x4d   :  { %133 = vst [vmem:[#allocation7 + $0x8] sm:$0xff] %v131_v0 }
  0x4e   :  { %216 = shalt.err (!%p213_p9)
}
  0x4f   :  { %143 = dma.vmem_to_hbm [thread:$0]  %s141_s29, 256, %s326_s2, [#allocation4]  }
  0x50   :  { %229 = dma.done.wait [#allocation4], 256  }
  0x51   :  { %230 = vsyncadd [#allocation4], 4294967040 }
  0x52   :  { %147 = vsyncpa [#allocation3], 1 }
  0x53   :  { %148 = vsyncpa [#allocation4], 1 }
  0x54   :  { %149 = vsyncpa [#allocation5], 1 }

</bundles_post_ra>
